<compile_context>
chip_gen: v7x
topology: tpu7x:2x2x1
jax: 0.10.0
libtpu: 0.0.40
codegen_flags: <defaults>
</compile_context>

<pallas_src>
import math
import jax
import jax.numpy as jnp
from jax import lax
from jax.experimental import pallas as pl
from jax.experimental.pallas import tpu as pltpu

_INV_SQRT2 = 1.0 / math.sqrt(2.0)
_SQRT_2_OVER_PI = math.sqrt(2.0 / math.pi)


def _round_up(n, m):
    return ((n + m - 1) // m) * m


def _cdiv(a, b):
    return (a + b - 1) // b


def _make_ffn_kernel(approximate_gelu):
    def kernel(x_ref, w1_ref, b1_ref, w2_ref, b2_ref, o_ref, acc_ref):
        j = pl.program_id(1)

        @pl.when(j == 0)
        def _init():
            acc_ref[...] = jnp.zeros_like(acc_ref)

        # Linear 1, partial over this hidden tile: (tm, dim) @ (dim, th) -> f32.
        h = jnp.dot(x_ref[...], w1_ref[...], preferred_element_type=jnp.float32)
        h = h + b1_ref[...]                                   # bias (f32)
        if approximate_gelu:
            # tanh-approx GELU: tanh routes to the EUP slot (free when MXU-bound).
            h = 0.5 * h * (1.0 + jnp.tanh(_SQRT_2_OVER_PI * (h + 0.044715 * h * h * h)))
        else:
            # Exact erf-based GELU (PyTorch nn.GELU() default).
            h = 0.5 * h * (1.0 + lax.erf(h * _INV_SQRT2))
        # Dropout(p=0.0) / eval mode -> identity.
        # Linear 2, partial-sum over hidden: (tm, th) @ (th, dim) accumulated in f32.
        acc_ref[...] += jnp.dot(h.astype(w2_ref.dtype), w2_ref[...],
                                preferred_element_type=jnp.float32)

        @pl.when(j == pl.num_programs(1) - 1)
        def _finalize():
            o_ref[...] = (acc_ref[...] + b2_ref[...]).astype(o_ref.dtype)

    return kernel


def _device_kind():
    try:
        return jax.devices()[0].device_kind.lower()
    except Exception:
        return ""


def _vmem_capacity_bytes(kind):
    try:
        return int(pltpu.get_tpu_info().vmem_capacity_bytes)
    except Exception:
        return (64 << 20) if "v7" in kind else (128 << 20)


def _default_tiles(kind, vmem_cap):
    """Generation-aware (tm, th, vmem_ceiling_bytes)."""
    if "v7" in kind or vmem_cap <= (64 << 20):
        # v7x: 64 MiB physical VMEM per TC -- leave headroom for Mosaic internal scratch.
        return 512, 256, 52 << 20
    if "v6" in kind:
        # v6e: ~675 flop/byte roofline -> big row tile; 128 MiB VMEM available.
        return 768, 512, 100 << 20
    if "v5" in kind:
        # v5e: ~240 flop/byte -> tm=256 already compute-bound; 256/512 fit the 4x128 MXU.
        return 256, 512, 100 << 20
    return 512, 512, 64 << 20


def _pick_th(hidden, th_req):
    """Largest 128-multiple hidden tile <= th_req dividing (possibly padded) hidden."""
    th_req = max(128, (th_req // 128) * 128)
    hidden_pad = _round_up(hidden, 128)
    t = th_req
    while t > 128:
        if hidden_pad % t == 0:
            break
        t -= 128
    return t, hidden_pad


def _vmem_footprint(tm, th, dim, in_size, out_size, x_bufs=1):
    x_b = tm * dim * in_size * x_bufs                 # x row tile (single-buffered)
    w_b = (dim * th + th * dim) * in_size * 2         # double-buffered weight tiles
    b_b = (th + dim) * 4 * 2                          # biases
    o_b = tm * dim * out_size * 2                     # output tile (double-buffered)
    acc_b = tm * dim * 4                              # f32 accumulator scratch
    tmp_b = tm * th * 4 * 2                           # f32 GELU temp + cast scratch
    return x_b + w_b + b_b + o_b + acc_b + tmp_b


def feed_forward_pallas(x, w1, b1, w2, b2, *, tm=None, th=None,
                        compute_dtype=jnp.bfloat16, approximate_gelu=False,
                        dropout_p=0.0, training=False):
    """FeedForward: Linear(dim->hidden) -> GELU -> Dropout -> Linear(hidden->dim) -> Dropout.

    Weights are stored (in, out) -- the transpose of PyTorch nn.Linear's (out, in).
    Pass w1/w2 already in `compute_dtype` (bf16) to avoid a per-call weight cast pass.
    """
    # TODO(synk): dropout with p>0 in training mode needs pltpu.prng_* masking in-kernel;
    # with p=0.0 (module default) or eval mode dropout is the identity.
    del dropout_p, training

    orig_shape = x.shape
    dim = orig_shape[-1]
    hidden = w1.shape[1]
    out_dtype = x.dtype

    x2d = x.reshape(-1, dim)
    M = x2d.shape[0]

    kind = _device_kind()
    vmem_cap = _vmem_capacity_bytes(kind)
    d_tm, d_th, vmem_ceiling = _default_tiles(kind, vmem_cap)
    tm = d_tm if tm is None else tm
    th = d_th if th is None else th

    in_size = jnp.dtype(compute_dtype).itemsize
    out_size = jnp.dtype(out_dtype).itemsize
    sublane = 16 if in_size < 4 else 8

    # Row tile: big for arithmetic intensity on streamed weights; never larger than the
    # sublane-rounded row count.  Ragged M handled by partial-block masking, not padding.
    tm_eff = min(_round_up(tm, sublane), _round_up(M, sublane))

    # v7x megacore: make sure the "parallel" rows axis has >= 2 iterations.
    if "v7" in kind and _cdiv(M, tm_eff) < 2 and M > sublane:
        tm_eff = max(sublane, _round_up(_cdiv(M, 2), sublane))

    # Hidden tile: largest 128-multiple divisor of (padded) hidden that is <= th.
    if hidden <= max(th, 128):
        th_eff, hidden_pad = hidden, hidden
    else:
        th_eff, hidden_pad = _pick_th(hidden, th)

    # Shrink the row tile until the estimated working set fits the VMEM budget.
    while (_vmem_footprint(tm_eff, th_eff, dim, in_size, out_size) > vmem_ceiling
           and tm_eff > 2 * sublane):
        tm_eff = max(sublane, _round_up(tm_eff // 2, sublane))

    footprint = _vmem_footprint(tm_eff, th_eff, dim, in_size, out_size)
    vmem_limit = int(min(vmem_ceiling, max(32 << 20, footprint + (8 << 20))))

    # Cast only when needed (keep weights pre-cast to bf16 to skip this entirely).
    if x2d.dtype != compute_dtype:
        x2d = x2d.astype(compute_dtype)
    w1c = w1 if w1.dtype == compute_dtype else w1.astype(compute_dtype)
    w2c = w2 if w2.dtype == compute_dtype else w2.astype(compute_dtype)
    b1_2d = b1.reshape(1, hidden).astype(jnp.float32)
    b2_2d = b2.reshape(1, dim).astype(jnp.float32)

    # Rare path: hidden not lane-aligned -> zero-pad (padded cols/rows contribute exactly 0).
    if hidden_pad != hidden:
        pad_h = hidden_pad - hidden
        w1c = jnp.pad(w1c, ((0, 0), (0, pad_h)))
        b1_2d = jnp.pad(b1_2d, ((0, 0), (0, pad_h)))
        w2c = jnp.pad(w2c, ((0, pad_h), (0, 0)))

    gm = _cdiv(M, tm_eff)
    gh = hidden_pad // th_eff
    grid = (gm, gh)

    cost = pl.CostEstimate(
        flops=4 * M * hidden * dim,
        transcendentals=M * hidden,
        bytes_accessed=(M * dim * (in_size + out_size)
                        + gm * 2 * dim * hidden_pad * in_size
                        + (hidden_pad + dim) * 4),
    )

    kernel = _make_ffn_kernel(approximate_gelu)

    def _run(x_single_buffer):
        x_kwargs = dict(pipeline_mode=pl.Buffered(1)) if x_single_buffer else {}
        return pl.pallas_call(
            kernel,
            out_shape=jax.ShapeDtypeStruct((M, dim), out_dtype),
            grid_spec=pltpu.PrefetchScalarGridSpec(
                num_scalar_prefetch=0,
                grid=grid,
                in_specs=[
                    # x row tile: block index constant over j -> one buffer is enough.
                    pl.BlockSpec((tm_eff, dim), lambda i, j: (i, 0), **x_kwargs),
                    pl.BlockSpec((dim, th_eff), lambda i, j: (0, j)),   # W1 hidden tile
                    pl.BlockSpec((1, th_eff), lambda i, j: (0, j)),     # b1 hidden tile
                    pl.BlockSpec((th_eff, dim), lambda i, j: (j, 0)),   # W2 hidden tile
                    pl.BlockSpec((1, dim), lambda i, j: (0, 0)),        # b2 (resident)
                ],
                out_specs=pl.BlockSpec((tm_eff, dim), lambda i, j: (i, 0)),
                scratch_shapes=[pltpu.VMEM((tm_eff, dim), jnp.float32)],
            ),
            compiler_params=pltpu.CompilerParams(
                dimension_semantics=("parallel", "arbitrary"),
                vmem_limit_bytes=vmem_limit,
            ),
            cost_estimate=cost,
        )(x2d, w1c, b1_2d, w2c, b2_2d)

    try:
        out = _run(x_single_buffer=True)
    except Exception:
        # pl.Buffered(1) unsupported on this jax/libtpu combo -> default buffering.
        out = _run(x_single_buffer=False)

    return out.reshape(orig_shape)


def feed_forward_ref(x, w1, b1, w2, b2):
    h = x @ w1 + b1
    h = 0.5 * h * (1.0 + lax.erf(h * _INV_SQRT2))
    return h @ w2 + b2


if __name__ == "__main__":
    key = jax.random.PRNGKey(0)

    def init_ffn(k, dim, hidden):
        k_w1, k_b1, k_w2, k_b2 = jax.random.split(k, 4)
        lim1 = 1.0 / math.sqrt(dim)
        lim2 = 1.0 / math.sqrt(hidden)
        w1 = jax.random.uniform(k_w1, (dim, hidden), jnp.float32, -lim1, lim1)
        b1 = jax.random.uniform(k_b1, (hidden,), jnp.float32, -lim1, lim1)
        w2 = jax.random.uniform(k_w2, (hidden, dim), jnp.float32, -lim2, lim2)
        b2 = jax.random.uniform(k_b2, (dim,), jnp.float32, -lim2, lim2)
        return w1, b1, w2, b2

    # Small, module-consistent shapes; ragged M=18 exercises partial-block handling,
    # th=128 < hidden exercises the hidden-axis accumulation path.
    batch, seq, dim, hidden = 2, 9, 128, 256
    k_x, k_p, k_p2 = jax.random.split(key, 3)
    w1, b1, w2, b2 = init_ffn(k_p, dim, hidden)
    x = jax.random.normal(k_x, (batch, seq, dim), jnp.float32)

    ref = feed_forward_ref(x, w1, b1, w2, b2)

    # f32 compute path: tight check of tiling / accumulation / partial last block.
    out_f32 = jax.block_until_ready(
        feed_forward_pallas(x, w1, b1, w2, b2, th=128, compute_dtype=jnp.float32))
    assert out_f32.shape == x.shape
    assert jnp.allclose(out_f32, ref, atol=1e-5, rtol=1e-5), "f32 path mismatch vs reference"

    # Default bf16 MXU path (f32 accumulation): loose tolerance for bf16 operand rounding.
    out_bf16 = jax.block_until_ready(feed_forward_pallas(x, w1, b1, w2, b2, th=128))
    assert out_bf16.shape == x.shape
    assert jnp.allclose(out_bf16, ref, atol=5e-2, rtol=5e-2), "bf16 path mismatch vs reference"

    # tanh-approx GELU path (EUP-routed) -- close enough to the erf reference.
    out_tanh = jax.block_until_ready(
        feed_forward_pallas(x, w1, b1, w2, b2, th=128, approximate_gelu=True))
    assert jnp.allclose(out_tanh, ref, atol=5e-2, rtol=5e-2), "tanh-GELU path mismatch"

    # Non-128-multiple hidden: exercises the zero-pad hidden path (exact in f32).
    hidden2 = 192
    w1b, b1b, w2b, b2b = init_ffn(k_p2, dim, hidden2)
    ref2 = feed_forward_ref(x, w1b, b1b, w2b, b2b)
    out2 = jax.block_until_ready(
        feed_forward_pallas(x, w1b, b1b, w2b, b2b, th=128, compute_dtype=jnp.float32))
    assert jnp.allclose(out2, ref2, atol=1e-5, rtol=1e-5), "padded-hidden path mismatch"

    print("KERNEL_OK")
</pallas_src>

<mosaic_0001>
module attributes {stable_mosaic.version = 11 : i64} {
  func.func @kernel(%arg0: i32, %arg1: i32, %arg2: memref<24x128xf32, #tpu.memory_space<vmem>>, %arg3: memref<128x128xf32, #tpu.memory_space<vmem>>, %arg4: memref<1x128xf32, #tpu.memory_space<vmem>>, %arg5: memref<128x128xf32, #tpu.memory_space<vmem>>, %arg6: memref<1x128xf32, #tpu.memory_space<vmem>>, %arg7: memref<24x128xf32, #tpu.memory_space<vmem>>, %arg8: memref<24x128xf32, #tpu.memory_space<vmem>>) attributes {dimension_semantics = [#tpu.dimension_semantics<parallel>, #tpu.dimension_semantics<arbitrary>], iteration_bounds = array<i64: 1, 2>, scalar_prefetch = 0 : i64, scratch_operands = 1 : i64, tpu.core_type = #tpu.core_type<tc>, window_params = [{pipeline_mode = #tpu.pipeline_mode<synchronous>, transform_indices = @transform_0, window_bounds = array<i64: 24, 128>}, {transform_indices = @transform_1, window_bounds = array<i64: 128, 128>}, {transform_indices = @transform_2, window_bounds = array<i64: 1, 128>}, {transform_indices = @transform_3, window_bounds = array<i64: 128, 128>}, {pipeline_mode = #tpu.pipeline_mode<synchronous>, transform_indices = @transform_4, window_bounds = array<i64: 1, 128>}, {transform_indices = @transform_5, window_bounds = array<i64: 24, 128>}]} {
    %c0_i32 = arith.constant 0 : i32
    %0 = arith.cmpi eq, %arg1, %c0_i32 : i32
    %1 = arith.extui %0 : i1 to i32
    %c0_i32_0 = arith.constant 0 : i32
    %2 = arith.cmpi ne, %1, %c0_i32_0 : i32
    scf.if %2 {
      %cst_17 = arith.constant 0.000000e+00 : f32
      %25 = vector.broadcast %cst_17 : f32 to vector<24x128xf32>
      %c0_18 = arith.constant 0 : index
      %c0_19 = arith.constant 0 : index
      %26 = vector.load %arg8[%c0_18, %c0_19] : memref<24x128xf32, #tpu.memory_space<vmem>>, vector<24x128xf32>
      tpu.vector_store %arg8[%c0_18, %c0_19], %25 {strides = array<i32>} : memref<24x128xf32, #tpu.memory_space<vmem>>, vector<24x128xf32>,
    } else {
    }
    %c0 = arith.constant 0 : index
    %c0_1 = arith.constant 0 : index
    %3 = vector.load %arg2[%c0, %c0_1] : memref<24x128xf32, #tpu.memory_space<vmem>>, vector<24x128xf32>
    %c0_2 = arith.constant 0 : index
    %c0_3 = arith.constant 0 : index
    %4 = vector.load %arg3[%c0_2, %c0_3] : memref<128x128xf32, #tpu.memory_space<vmem>>, vector<128x128xf32>
    %cst = arith.constant dense<0.000000e+00> : vector<24x128xf32>
    %5 = tpu.matmul %3, %4, %cst {dimension_numbers = #tpu.dot_dimension_numbers<[1], [0], [0], [1], [0, 0, 1, 1], [], []>} : vector<24x128xf32>, vector<128x128xf32>, vector<24x128xf32> -> vector<24x128xf32>
    %c0_4 = arith.constant 0 : index
    %c0_5 = arith.constant 0 : index
    %6 = vector.load %arg4[%c0_4, %c0_5] : memref<1x128xf32, #tpu.memory_space<vmem>>, vector<1x128xf32>
    %7 = vector.broadcast %6 : vector<1x128xf32> to vector<24x128xf32>
    %8 = arith.addf %5, %7 : vector<24x128xf32>
    %cst_6 = arith.constant 5.000000e-01 : f32
    %9 = vector.broadcast %cst_6 : f32 to vector<24x128xf32>
    %10 = arith.mulf %9, %8 : vector<24x128xf32>
    %cst_7 = arith.constant 0.707106769 : f32
    %11 = vector.broadcast %cst_7 : f32 to vector<24x128xf32>
    %12 = arith.mulf %8, %11 : vector<24x128xf32>
    %13 = math.erf %12 : vector<24x128xf32>
    %cst_8 = arith.constant 1.000000e+00 : f32
    %14 = vector.broadcast %cst_8 : f32 to vector<24x128xf32>
    %15 = arith.addf %14, %13 : vector<24x128xf32>
    %16 = arith.mulf %10, %15 : vector<24x128xf32>
    %c0_9 = arith.constant 0 : index
    %c0_10 = arith.constant 0 : index
    %17 = vector.load %arg8[%c0_9, %c0_10] : memref<24x128xf32, #tpu.memory_space<vmem>>, vector<24x128xf32>
    %c0_11 = arith.constant 0 : index
    %c0_12 = arith.constant 0 : index
    %18 = vector.load %arg5[%c0_11, %c0_12] : memref<128x128xf32, #tpu.memory_space<vmem>>, vector<128x128xf32>
    %cst_13 = arith.constant dense<0.000000e+00> : vector<24x128xf32>
    %19 = tpu.matmul %16, %18, %cst_13 {dimension_numbers = #tpu.dot_dimension_numbers<[1], [0], [0], [1], [0, 0, 1, 1], [], []>} : vector<24x128xf32>, vector<128x128xf32>, vector<24x128xf32> -> vector<24x128xf32>
    %20 = arith.addf %17, %19 : vector<24x128xf32>
    %c0_14 = arith.constant 0 : index
    %c0_15 = arith.constant 0 : index
    %21 = vector.load %arg8[%c0_14, %c0_15] : memref<24x128xf32, #tpu.memory_space<vmem>>, vector<24x128xf32>
    tpu.vector_store %arg8[%c0_14, %c0_15], %20 {strides = array<i32>} : memref<24x128xf32, #tpu.memory_space<vmem>>, vector<24x128xf32>,
    %c1_i32 = arith.constant 1 : i32
    %22 = arith.cmpi eq, %arg1, %c1_i32 : i32
    %23 = arith.extui %22 : i1 to i32
    %c0_i32_16 = arith.constant 0 : i32
    %24 = arith.cmpi ne, %23, %c0_i32_16 : i32
    scf.if %24 {
      %c0_17 = arith.constant 0 : index
      %c0_18 = arith.constant 0 : index
      %25 = vector.load %arg8[%c0_17, %c0_18] : memref<24x128xf32, #tpu.memory_space<vmem>>, vector<24x128xf32>
      %c0_19 = arith.constant 0 : index
      %c0_20 = arith.constant 0 : index
      %26 = vector.load %arg6[%c0_19, %c0_20] : memref<1x128xf32, #tpu.memory_space<vmem>>, vector<1x128xf32>
      %27 = vector.broadcast %26 : vector<1x128xf32> to vector<24x128xf32>
      %28 = arith.addf %25, %27 : vector<24x128xf32>
      %c0_21 = arith.constant 0 : index
      %c0_22 = arith.constant 0 : index
      %29 = vector.load %arg7[%c0_21, %c0_22] : memref<24x128xf32, #tpu.memory_space<vmem>>, vector<24x128xf32>
      tpu.vector_store %arg7[%c0_21, %c0_22], %28 {strides = array<i32>} : memref<24x128xf32, #tpu.memory_space<vmem>>, vector<24x128xf32>,
    } else {
    }
    return
  }
  func.func @transform_0(%arg0: i32, %arg1: i32) -> (i32, i32) {
    %c0_i32 = arith.constant 0 : i32
    %c0_i32_0 = arith.constant 0 : i32
    return %arg0, %c0_i32 : i32, i32
  }
  func.func @transform_1(%arg0: i32, %arg1: i32) -> (i32, i32) {
    %c0_i32 = arith.constant 0 : i32
    %c0_i32_0 = arith.constant 0 : i32
    return %c0_i32, %arg1 : i32, i32
  }
  func.func @transform_2(%arg0: i32, %arg1: i32) -> (i32, i32) {
    %c0_i32 = arith.constant 0 : i32
    %c0_i32_0 = arith.constant 0 : i32
    return %c0_i32, %arg1 : i32, i32
  }
  func.func @transform_3(%arg0: i32, %arg1: i32) -> (i32, i32) {
    %c0_i32 = arith.constant 0 : i32
    %c0_i32_0 = arith.constant 0 : i32
    return %arg1, %c0_i32 : i32, i32
  }
  func.func @transform_4(%arg0: i32, %arg1: i32) -> (i32, i32) {
    %c0_i32 = arith.constant 0 : i32
    %c0_i32_0 = arith.constant 0 : i32
    %c0_i32_1 = arith.constant 0 : i32
    return %c0_i32, %c0_i32_0 : i32, i32
  }
  func.func @transform_5(%arg0: i32, %arg1: i32) -> (i32, i32) {
    %c0_i32 = arith.constant 0 : i32
    %c0_i32_0 = arith.constant 0 : i32
    return %arg0, %c0_i32 : i32, i32
  }
}

module attributes {stable_mosaic.version = 11 : i64} {
  func.func @kernel(%arg0: i32, %arg1: i32, %arg2: memref<24x128xf32, #tpu.memory_space<vmem>>, %arg3: memref<128x128xf32, #tpu.memory_space<vmem>>, %arg4: memref<1x128xf32, #tpu.memory_space<vmem>>, %arg5: memref<128x128xf32, #tpu.memory_space<vmem>>, %arg6: memref<1x128xf32, #tpu.memory_space<vmem>>, %arg7: memref<24x128xf32, #tpu.memory_space<vmem>>, %arg8: memref<24x128xf32, #tpu.memory_space<vmem>>) attributes {dimension_semantics = [#tpu.dimension_semantics<parallel>, #tpu.dimension_semantics<arbitrary>], iteration_bounds = array<i64: 1, 2>, scalar_prefetch = 0 : i64, scratch_operands = 1 : i64, tpu.core_type = #tpu.core_type<tc>, window_params = [{transform_indices = @transform_0, window_bounds = array<i64: 24, 128>}, {transform_indices = @transform_1, window_bounds = array<i64: 128, 128>}, {transform_indices = @transform_2, window_bounds = array<i64: 1, 128>}, {transform_indices = @transform_3, window_bounds = array<i64: 128, 128>}, {pipeline_mode = #tpu.pipeline_mode<synchronous>, transform_indices = @transform_4, window_bounds = array<i64: 1, 128>}, {transform_indices = @transform_5, window_bounds = array<i64: 24, 128>}]} {
    %c0_i32 = arith.constant 0 : i32
    %0 = arith.cmpi eq, %arg1, %c0_i32 : i32
    %1 = arith.extui %0 : i1 to i32
    %c0_i32_0 = arith.constant 0 : i32
    %2 = arith.cmpi ne, %1, %c0_i32_0 : i32
    scf.if %2 {
      %cst_17 = arith.constant 0.000000e+00 : f32
      %25 = vector.broadcast %cst_17 : f32 to vector<24x128xf32>
      %c0_18 = arith.constant 0 : index
      %c0_19 = arith.constant 0 : index
      %26 = vector.load %arg8[%c0_18, %c0_19] : memref<24x128xf32, #tpu.memory_space<vmem>>, vector<24x128xf32>
      tpu.vector_store %arg8[%c0_18, %c0_19], %25 {strides = array<i32>} : memref<24x128xf32, #tpu.memory_space<vmem>>, vector<24x128xf32>,
    } else {
    }
    %c0 = arith.constant 0 : index
    %c0_1 = arith.constant 0 : index
    %3 = vector.load %arg2[%c0, %c0_1] : memref<24x128xf32, #tpu.memory_space<vmem>>, vector<24x128xf32>
    %c0_2 = arith.constant 0 : index
    %c0_3 = arith.constant 0 : index
    %4 = vector.load %arg3[%c0_2, %c0_3] : memref<128x128xf32, #tpu.memory_space<vmem>>, vector<128x128xf32>
    %cst = arith.constant dense<0.000000e+00> : vector<24x128xf32>
    %5 = tpu.matmul %3, %4, %cst {dimension_numbers = #tpu.dot_dimension_numbers<[1], [0], [0], [1], [0, 0, 1, 1], [], []>} : vector<24x128xf32>, vector<128x128xf32>, vector<24x128xf32> -> vector<24x128xf32>
    %c0_4 = arith.constant 0 : index
    %c0_5 = arith.constant 0 : index
    %6 = vector.load %arg4[%c0_4, %c0_5] : memref<1x128xf32, #tpu.memory_space<vmem>>, vector<1x128xf32>
    %7 = vector.broadcast %6 : vector<1x128xf32> to vector<24x128xf32>
    %8 = arith.addf %5, %7 : vector<24x128xf32>
    %cst_6 = arith.constant 5.000000e-01 : f32
    %9 = vector.broadcast %cst_6 : f32 to vector<24x128xf32>
    %10 = arith.mulf %9, %8 : vector<24x128xf32>
    %cst_7 = arith.constant 0.707106769 : f32
    %11 = vector.broadcast %cst_7 : f32 to vector<24x128xf32>
    %12 = arith.mulf %8, %11 : vector<24x128xf32>
    %13 = math.erf %12 : vector<24x128xf32>
    %cst_8 = arith.constant 1.000000e+00 : f32
    %14 = vector.broadcast %cst_8 : f32 to vector<24x128xf32>
    %15 = arith.addf %14, %13 : vector<24x128xf32>
    %16 = arith.mulf %10, %15 : vector<24x128xf32>
    %c0_9 = arith.constant 0 : index
    %c0_10 = arith.constant 0 : index
    %17 = vector.load %arg8[%c0_9, %c0_10] : memref<24x128xf32, #tpu.memory_space<vmem>>, vector<24x128xf32>
    %c0_11 = arith.constant 0 : index
    %c0_12 = arith.constant 0 : index
    %18 = vector.load %arg5[%c0_11, %c0_12] : memref<128x128xf32, #tpu.memory_space<vmem>>, vector<128x128xf32>
    %cst_13 = arith.constant dense<0.000000e+00> : vector<24x128xf32>
    %19 = tpu.matmul %16, %18, %cst_13 {dimension_numbers = #tpu.dot_dimension_numbers<[1], [0], [0], [1], [0, 0, 1, 1], [], []>} : vector<24x128xf32>, vector<128x128xf32>, vector<24x128xf32> -> vector<24x128xf32>
    %20 = arith.addf %17, %19 : vector<24x128xf32>
    %c0_14 = arith.constant 0 : index
    %c0_15 = arith.constant 0 : index
    %21 = vector.load %arg8[%c0_14, %c0_15] : memref<24x128xf32, #tpu.memory_space<vmem>>, vector<24x128xf32>
    tpu.vector_store %arg8[%c0_14, %c0_15], %20 {strides = array<i32>} : memref<24x128xf32, #tpu.memory_space<vmem>>, vector<24x128xf32>,
    %c1_i32 = arith.constant 1 : i32
    %22 = arith.cmpi eq, %arg1, %c1_i32 : i32
    %23 = arith.extui %22 : i1 to i32
    %c0_i32_16 = arith.constant 0 : i32
    %24 = arith.cmpi ne, %23, %c0_i32_16 : i32
    scf.if %24 {
      %c0_17 = arith.constant 0 : index
      %c0_18 = arith.constant 0 : index
      %25 = vector.load %arg8[%c0_17, %c0_18] : memref<24x128xf32, #tpu.memory_space<vmem>>, vector<24x128xf32>
      %c0_19 = arith.constant 0 : index
      %c0_20 = arith.constant 0 : index
      %26 = vector.load %arg6[%c0_19, %c0_20] : memref<1x128xf32, #tpu.memory_space<vmem>>, vector<1x128xf32>
      %27 = vector.broadcast %26 : vector<1x128xf32> to vector<24x128xf32>
      %28 = arith.addf %25, %27 : vector<24x128xf32>
      %c0_21 = arith.constant 0 : index
      %c0_22 = arith.constant 0 : index
      %29 = vector.load %arg7[%c0_21, %c0_22] : memref<24x128xf32, #tpu.memory_space<vmem>>, vector<24x128xf32>
      tpu.vector_store %arg7[%c0_21, %c0_22], %28 {strides = array<i32>} : memref<24x128xf32, #tpu.memory_space<vmem>>, vector<24x128xf32>,
    } else {
    }
    return
  }
  func.func @transform_0(%arg0: i32, %arg1: i32) -> (i32, i32) {
    %c0_i32 = arith.constant 0 : i32
    %c0_i32_0 = arith.constant 0 : i32
    return %arg0, %c0_i32 : i32, i32
  }
  func.func @transform_1(%arg0: i32, %arg1: i32) -> (i32, i32) {
    %c0_i32 = arith.constant 0 : i32
    %c0_i32_0 = arith.constant 0 : i32
    return %c0_i32, %arg1 : i32, i32
  }
  func.func @transform_2(%arg0: i32, %arg1: i32) -> (i32, i32) {
    %c0_i32 = arith.constant 0 : i32
    %c0_i32_0 = arith.constant 0 : i32
    return %c0_i32, %arg1 : i32, i32
  }
  func.func @transform_3(%arg0: i32, %arg1: i32) -> (i32, i32) {
    %c0_i32 = arith.constant 0 : i32
    %c0_i32_0 = arith.constant 0 : i32
    return %arg1, %c0_i32 : i32, i32
  }
  func.func @transform_4(%arg0: i32, %arg1: i32) -> (i32, i32) {
    %c0_i32 = arith.constant 0 : i32
    %c0_i32_0 = arith.constant 0 : i32
    %c0_i32_1 = arith.constant 0 : i32
    return %c0_i32, %c0_i32_0 : i32, i32
  }
  func.func @transform_5(%arg0: i32, %arg1: i32) -> (i32, i32) {
    %c0_i32 = arith.constant 0 : i32
    %c0_i32_0 = arith.constant 0 : i32
    return %arg0, %c0_i32 : i32, i32
  }
}

</mosaic_0001>

<bundles_post_ra>
// kernel: tpu_custom_call.1
= control target key start
LH: loop header
LB: loop body
LE: loop exit
PB: predicated region body
PF: predicated region fallthrough
CT: control target
= control target key end

     0   :  { %10 = vsyncpa [#allocation4], 0  ;;  %s1512_s0 = inlined_call_operand.hbm [shape: f32[18,128], index: 0, kind: input, shape index: {}]   ;;  %s1513_s1 = inlined_call_operand.hbm [shape: f32[128,256], index: 1, kind: input, shape index: {}]   ;;  %s1514_s2 = inlined_call_operand.vmem [shape: f32[1,256], index: 2, kind: input, shape index: {}]   ;;  %s1515_s3 = inlined_call_operand.hbm [shape: f32[256,128], index: 3, kind: input, shape index: {}]   ;;  %s1516_s4 = inlined_call_operand.vmem [shape: f32[1,128], index: 4, kind: input, shape index: {}]   ;;  %s1517_s5 = inlined_call_operand.hbm [shape: f32[18,128], index: 5, kind: output, shape index: {}]  }
   0x1   :  { %11 = vsyncpa [#allocation7], 0 }
   0x2   :  { %13 = vsyncpa [#allocation7 + $0x1], 0 }
   0x3   :  { %14 = vsyncpa [#allocation5], 0  ;;  %s1193_s18 = smov 0   ;;  %s1195_s19 = smov 0  }
   0x4   :  { %s1197_s20 = smov 0   ;;  %s1199_s21 = smov 0  }
   0x5   :  { %s1201_s22 = smov 0   ;;  %s1203_s23 = smov 0  }
   0x6 LB: > { %s29_s24 = sadd.s32 1, %s1144_s22  ;;  %s65_s25 = sadd.s32 1, %s1136_s20  ;;  %s1148_s23 = sphi %s1203_s23, %s20_s23   ;;  %s1144_s22 = sphi %s1201_s22, %s1534_s22   ;;  %s1140_s21 = sphi %s1199_s21, %s1533_s21   ;;  %s1136_s20 = sphi %s1197_s20, %s1532_s20   ;;  %s1132_s19 = sphi %s1195_s19, %s1531_s19   ;;  %s1128_s18 = sphi %s1193_s18, %s1530_s18  }
   0x7   : > { %p30_p0 = scmp.ge.s32.totalorder %s29_s24, 2  ;;  %p72_p1 = scmp.ne.s32.totalorder %s1136_s20, %s1132_s19 }
   0x8   : > { %p73_p2 = scmp.eq.s32.totalorder %s1148_s23, 0  ;;  %p907_p5 = scmp.lt.s32.totalorder %s1148_s23, 2 }
   0x9   : > { %s1536_s24 = smov (%p30_p0, %s29_s24), 0  ;;  %s220_s28 = sand.u32 1, %s1148_s23  }
   0xa   : > { %p1230_p3 = por %p73_p2, %p72_p1  ;;  %s62_s27 = ssub.s32 %s1144_s22, %s1536_s24 }
   0xb   : > { %p63_p4 = scmp.eq.s32.totalorder %s62_s27, 0  ;;  %s222_s29 = sand.u32 1, %s1136_s20  }
   0xc   : > { %s1242_s6 = sshll.u32 %s222_s29, 7  ;;  %s698_s7 = sshll.u32 %s1144_s22, 7 }
   0xd   : > { %s1240_s30 = scalar_select %p63_p4, %s1136_s20, %s65_s25  }
   0xe   : > { %s1248_s10 = scalar_lea.hbm %s1513_s1, %s698_s7  ;;  %s224_s11 = scalar_lea.vmem [#allocation6], %s1242_s6 }
   0xf   : > { %s230_s12 = sshll.u32 %s224_s11, 4  ;;  %p1255_p6 = pnand %p907_p5, %p1230_p3  ;;  %s1251_s12 = int_to_ptr.vmem [resolvable:$true] %s230_s12 }
  0x10   : > { %s1259_s14 = scalar_lea.sflag [#allocation7], %s220_s28  ;;  %s976_s15 = scalar_lea.hbm %s1248_s10, 2048 }
  0x11   : > { %p977_p7 = scmp.ne.s32.totalorder %s1248_s10, %s976_s15  ;;  %p978_p8 = pneg %p1255_p6 }
  0x12   : > { %s981_s25 = scalar_lea.hbm %s1513_s1, 4096  ;;  %p982_p11 = scmp.lt.u32.totalorder %s1248_s10, %s1513_s1 }
  0x13   : > { %p979_p9 = pnand %p978_p8, %p977_p7  ;;  %p983_p12 = scmp.lt.u32.totalorder %s981_s25, %s976_s15 }
  0x14   : > { %p985_p0 = scmp.lt.u32.totalorder %s976_s15, %s1248_s10 }
  0x15   : > { %p980_p10 = pneg %p979_p9  ;;  %p984_p13 = por %p983_p12, %p982_p11 }
  0x17   : > { %p986_p1 = por %p985_p0, %p984_p13 }
  0x19   : > { %p987_p2 = pnand %p986_p1, %p980_p10 }
  0x1b   : > { %990 = shalt.err (!%p987_p2)
}
  0x1c   : > { %s991_s28 = scalar_lea.vmem %s1251_s12, 2048  ;;  %s1150_s29 = smov [#allocation6]  }
  0x1d   : > { %p992_p3 = scmp.ne.s32.totalorder %s1251_s12, %s991_s28  ;;  %s996_s7 = sshll.u32 %s1150_s29, 4  ;;  %s997_s7 = int_to_ptr.vmem [resolvable:$false] %s996_s7 }
  0x1e   : > { %s998_s8 = scalar_lea.vmem %s997_s7, 4096  ;;  %p999_p7 = scmp.lt.s32.totalorder %s1251_s12, %s997_s7 }
  0x1f   : > { %p994_p4 = pnand %p992_p3, %p978_p8  ;;  %p1000_p9 = scmp.lt.s32.totalorder %s998_s8, %s991_s28 }
  0x21   : > { %p995_p5 = pneg %p994_p4  ;;  %p1001_p11 = por %p1000_p9, %p999_p7 }
  0x23   : > { %p1002_p12 = pnand %p1001_p11, %p995_p5 }
  0x25   : > { %1005 = shalt.err (!%p1002_p12)
}
  0x26   : > { %s1151_s9 = smov 256   ;;  %s1152_s11 = smov 128  }
  0x27   : > { %s1153_s15 = smov 8   ;;  %s1290_s16 = sadd.s32 4294967295, %s1148_s23  }
  0x28   : > { %902 = dma.hbm_to_vmem [thread:$0]  (!%p1255_p6), %s1248_s10, 2048, %s1251_s12, %s1259_s14, %s1151_s9, %s1152_s11, %s1153_s15  }
  0x29   : > { %p78_p10 = scmp.ne.s32.totalorder %s1132_s19, %s1128_s18  ;;  %p1518_p13 = scmp.eq.s32.totalorder %s1290_s16, 0 }
  0x2a   : > { %p694_p0 = scmp.ge.s32.totalorder %s1148_s23, 1  ;;  %p188_p1 = scmp.lt.s32.totalorder %s1148_s23, 3 }
  0x2b   : > { %p1299_p2 = por %p1518_p13, %p78_p10  ;;  %s1154_s10 = smov [#allocation3]  }
  0x2c   : > { %p1303_p3 = pnand %p694_p0, %p188_p1  ;;  %s203_s12 = sshll.u32 %s1154_s10, 4  ;;  %s1307_s12 = int_to_ptr.vmem [resolvable:$true] %s203_s12 }
  0x2d   : > { %s1523_s17 = scalar_select %p1299_p2, 1, 0 }
  0x2e   : > { %s1524_s25 = scalar_select %p1303_p3, 1, 0 }
  0x2f   : > { %p895_p4 = pneg %p1303_p3  ;;  %s714_s18 = sshll.u32 %s1144_s22, 11 }
  0x30   : > { %s1315_s28 = scalar_lea.hbm %s1515_s3, %s714_s18  ;;  %s250_s29 = scalar_lea.vmem [#allocation8], %s1242_s6 }
  0x31   : > { %s257_s7 = sshll.u32 %s250_s29, 4  ;;  %p1320_p5 = pnand %p895_p4, %p1518_p13  ;;  %s1324_s7 = int_to_ptr.vmem [resolvable:$true] %s257_s7 }
  0x32   : > { %s1006_s9 = scalar_lea.hbm %s1315_s28, 2048  ;;  %s1011_s26 = scalar_lea.hbm %s1515_s3, 4096 }
  0x33   : > { %p1007_p7 = scmp.ne.s32.totalorder %s1315_s28, %s1006_s9  ;;  %p1012_p12 = scmp.lt.u32.totalorder %s1315_s28, %s1515_s3 }
  0x34   : > { %p1013_p10 = scmp.lt.u32.totalorder %s1011_s26, %s1006_s9  ;;  %p1015_p1 = scmp.lt.u32.totalorder %s1006_s9, %s1315_s28 }
  0x35   : > { %p1009_p9 = pnand %p1007_p7, %p978_p8 }
  0x36   : > { %p1014_p0 = por %p1013_p10, %p1012_p12 }
  0x37   : > { %p1010_p11 = pneg %p1009_p9 }
  0x38   : > { %p1016_p4 = por %p1015_p1, %p1014_p0 }
  0x3a   : > { %p1017_p13 = pnand %p1016_p4, %p1010_p11 }
  0x3c   : > { %1020 = shalt.err (!%p1017_p13)
}
  0x3d   : > { %s1021_s29 = scalar_lea.vmem %s1324_s7, 2048  ;;  %s1155_s10 = smov [#allocation8]  }
  0x3e   : > { %p1022_p7 = scmp.ne.s32.totalorder %s1324_s7, %s1021_s29  ;;  %s1026_s18 = sshll.u32 %s1155_s10, 4  ;;  %s1027_s18 = int_to_ptr.vmem [resolvable:$false] %s1026_s18 }
  0x3f   : > { %s1028_s27 = scalar_lea.vmem %s1027_s18, 4096  ;;  %p1029_p3 = scmp.lt.s32.totalorder %s1324_s7, %s1027_s18 }
  0x40   : > { %p1024_p9 = pnand %p1022_p7, %p978_p8  ;;  %p1030_p12 = scmp.lt.s32.totalorder %s1028_s27, %s1021_s29 }
  0x42   : > { %p1025_p2 = pneg %p1024_p9  ;;  %p1031_p10 = por %p1030_p12, %p1029_p3 }
  0x44   : > { %p1032_p0 = pnand %p1031_p10, %p1025_p2 }
  0x46   : > { %1035 = shalt.err (!%p1032_p0)
}
  0x47   : > { %905 = dma.hbm_to_vmem [thread:$0]  (!%p1255_p6), %s1315_s28, 2048, %s1324_s7, %s1259_s14, %s1152_s11, %s1152_s11, %s1153_s15  }
  0x48   : > { %s1036_s6 = scalar_lea.hbm %s1512_s0, 384  ;;  %p1038_p13 = pneg %p1320_p5 }
  0x49   : > { %p1037_p8 = scmp.ne.s32.totalorder %s1512_s0, %s1036_s6  ;;  %p1043_p11 = scmp.lt.u32.totalorder %s1036_s6, %s1512_s0 }
  0x4b   : > { %p1039_p2 = pnand %p1038_p13, %p1037_p8 }
  0x4d   : > { %p1040_p3 = pneg %p1039_p2 }
  0x4f   : > { %p1045_p1 = pnand %p1043_p11, %p1040_p3 }
  0x51   : > { %1048 = shalt.err (!%p1045_p1)
}
  0x52   : > { %s1049_s14 = scalar_lea.vmem %s1307_s12, 384  ;;  %p1057_p9 = scmp.lt.s32.totalorder %s1307_s12, %s1307_s12 }
  0x53   : > { %p1050_p6 = scmp.ne.s32.totalorder %s1307_s12, %s1049_s14  ;;  %p1058_p12 = scmp.lt.s32.totalorder %s1049_s14, %s1049_s14 }
  0x55   : > { %p1052_p4 = pnand %p1050_p6, %p1038_p13  ;;  %p1059_p10 = por %p1058_p12, %p1057_p9 }
  0x57   : > { %p1053_p7 = pneg %p1052_p4 }
  0x59   : > { %p1060_p0 = pnand %p1059_p10, %p1053_p7 }
  0x5b   : > { %1063 = shalt.err (!%p1060_p0)
}
  0x5c   : > { %898 = dma.hbm_to_vmem [thread:$0]  (!%p1320_p5), %s1512_s0, 384, %s1307_s12, [#allocation4], %s1152_s11, %s1152_s11, %s1153_s15  }
  0x5d   : > { %p1526_p8 = scmp.ne.s32.totalorder %s1524_s25, 0 }
  0x5e   : > { %p1527_p13 = scmp.eq.s32.totalorder (!%p1526_p8), %s1290_s16, 0 }
  0x5f   : > { %269 = sbr.rel (%p1526_p8) target bundleno = 642 (0x282), region = 40 }
  0x66   : > { %1115 = dma.done.wait (%p1527_p13), [#allocation4], 384   ;;  %p1528_p2 = pmov %p1527_p13 }
  0x67   : > { %s275_s8 = sand.u32 1, %s1290_s16   ;;  %s277_s27 = sand.u32 1, %s1132_s19  }
  0x68   : > { %1117 = vsyncadd (%p1528_p2), [#allocation4], 4294966912  ;;  %s704_s9 = sshll.u32 %s277_s27, 7  ;;  %s276_s26 = scalar_lea.sflag [#allocation7], %s275_s8 }
  0x69   : > { %s1385_s6 = scalar_lea.vmem [#allocation6], %s704_s9  ;;  %p1529_p3 = scmp.ne.s32.totalorder %s1523_s17, 0 }
  0x6b   : > { %1119 = dma.done.wait (%p1529_p3), %s276_s26, 4096  }
  0x6c   : > { %1121 = vsyncadd (%p1529_p3), %s276_s26, 4294963200  ;;  %p319_p5 = scmp.lt.s32.totalorder %s1140_s21, 1  ;;  %s1399_s10 = scalar_lea.vmem [#allocation8], %s704_s9 }
  0x6d   : > { %p706_p11 = scmp.ne.s32.totalorder %s1140_s21, 0 }
  0x6e   : > { %s1393_s11 = scalar_select %p319_p5, %s1140_s21, 1 }
  0x6f   : > { %327 = sbr.rel (%p706_p11) target bundleno = 118 (0x76), region = 56  ;;  %v1156_v0 = vmov (!%p706_p11), 0.0  }
  0x70   : > { %s321_s12 = scalar_lea.vmem %s1514_s2, %s1393_s11  ;;  %328 = vst [vmem:[#allocation2] sm:$0xff] (!%p706_p11), %v1156_v0  ;;  %329 = vst [vmem:[#allocation2 + $0x8] sm:$0xff] (!%p706_p11), %v1156_v0 }
  0x71   : > { %330 = vst [vmem:[#allocation2 + $0x10] sm:$0xff] (!%p706_p11), %v1156_v0 }
  0x76 PF: > { %v334_v1 = vld [vmem:[%s1385_s6] sm:$0xff]  ;;  %v335_v2 = vld [vmem:[%s1385_s6 + $0x8] sm:$0xff]  ;;  %v336_v3 = vld [vmem:[%s1385_s6 + $0x10] sm:$0xff]  ;;  %v1157_v4 = vmov 0.0|0.0   ;;  %vm1158_vm0 = vmmov 0   ;;  %v1159_v7 = vmov 0.0  }
  0x77   : > { %835 = vmatprep.subr.bf16.mxu0 %v1157_v4  ;;  %v836_v5 = vpack.c.bf16 %v335_v2, %v334_v1  ;;  %v337_v6 = vld [vmem:[%s1385_s6 + $0x18] sm:$0xff]  ;;  %785 = vmatprep.mubr.msk.f32.mxu0 %vm1158_vm0, %v1159_v7  ;;  %v338_v9 = vld [vmem:[%s1385_s6 + $0x20] sm:$0xff]  ;;  %v339_v10 = vld [vmem:[%s1385_s6 + $0x28] sm:$0xff]  ;;  %p708_p1 = scmp.ne.s32.totalorder %s1140_s21, 1 }
  0x78   : > { %859 = vmatprep.subr.bf16.mxu1 %v1157_v4  ;;  %826 = vmatprep.mubr.msk.f32.mxu1 %vm1158_vm0, %v1159_v7  ;;  %v839_v8 = vpack.c.bf16 %v337_v6, %v336_v3  ;;  %v455_v11 = vld [vmem:[%s1399_s10] sm:$0xff]  ;;  %v456_v12 = vld [vmem:[%s1399_s10 + $0x8] sm:$0xff]  ;;  %v842_v13 = vpack.c.bf16 %v339_v10, %v338_v9  ;;  %v457_v15 = vld [vmem:[%s1399_s10 + $0x10] sm:$0xff] }
  0x79   : > { %837 = vmatpush3.bf16.msra.mxu0 %v836_v5  ;;  %v860_v14 = vpack.c.bf16 %v456_v12, %v455_v11  ;;  %v458_v16 = vld [vmem:[%s1399_s10 + $0x18] sm:$0xff]  ;;  %v340_v17 = vld [vmem:[%s1385_s6 + $0x30] sm:$0xff]  ;;  %v459_v20 = vld [vmem:[%s1399_s10 + $0x20] sm:$0xff] }
  0x7a   : > { %838 = vmatprep.subr.bf16.mxu0 %v1157_v4  ;;  %v341_v18 = vld [vmem:[%s1385_s6 + $0x38] sm:$0xff]  ;;  %v863_v19 = vpack.c.bf16 %v458_v16, %v457_v15  ;;  %v460_v21 = vld [vmem:[%s1399_s10 + $0x28] sm:$0xff]  ;;  %v342_v23 = vld [vmem:[%s1385_s6 + $0x40] sm:$0xff] }
  0x7b   : > { %861 = vmatpush3.bf16.msra.mxu1 %v860_v14  ;;  %v845_v22 = vpack.c.bf16 %v341_v18, %v340_v17  ;;  %v343_v24 = vld [vmem:[%s1385_s6 + $0x48] sm:$0xff]  ;;  %v866_v25 = vpack.c.bf16 %v460_v21, %v459_v20  ;;  %v344_v27 = vld [vmem:[%s1385_s6 + $0x50] sm:$0xff]  ;;  %v345_v28 = vld [vmem:[%s1385_s6 + $0x58] sm:$0xff] }
  0x7c   : > { %862 = vmatprep.subr.bf16.mxu1 %v1157_v4  ;;  %v848_v26 = vpack.c.bf16 %v343_v24, %v342_v23  ;;  %v851_v29 = vpack.c.bf16 %v345_v28, %v344_v27  ;;  %v346_v30 = vld [vmem:[%s1385_s6 + $0x60] sm:$0xff]  ;;  %v347_v31 = vld [vmem:[%s1385_s6 + $0x68] sm:$0xff]  ;;  %v348_v33 = vld [vmem:[%s1385_s6 + $0x70] sm:$0xff] }
  0x7d   : > { %840 = vmatpush3.bf16.msra.mxu0 %v839_v8  ;;  %v854_v32 = vpack.c.bf16 %v347_v31, %v346_v30  ;;  %v349_v34 = vld [vmem:[%s1385_s6 + $0x78] sm:$0xff]  ;;  %v331_v36 = vld [vmem:[#allocation3] sm:$0xff]  ;;  %v332_v37 = vld [vmem:[#allocation3 + $0x8] sm:$0xff] }
  0x7e   : > { %841 = vmatprep.subr.bf16.mxu0 %v1157_v4  ;;  %v857_v35 = vpack.c.bf16 %v349_v34, %v348_v33  ;;  %v333_v38 = vld [vmem:[#allocation3 + $0x10] sm:$0xff]  ;;  %v461_v39 = vld [vmem:[%s1399_s10 + $0x30] sm:$0xff]  ;;  %v463_v42 = vld [vmem:[%s1399_s10 + $0x40] sm:$0xff] }
  0x7f   : > { %864 = vmatpush3.bf16.msra.mxu1 %v863_v19  ;;  %v462_v40 = vld [vmem:[%s1399_s10 + $0x38] sm:$0xff]  ;;  %v464_v43 = vld [vmem:[%s1399_s10 + $0x48] sm:$0xff]  ;;  %v465_v45 = vld [vmem:[%s1399_s10 + $0x50] sm:$0xff] }
  0x80   : > { %865 = vmatprep.subr.bf16.mxu1 %v1157_v4  ;;  %v869_v41 = vpack.c.bf16 %v462_v40, %v461_v39  ;;  %v872_v44 = vpack.c.bf16 %v464_v43, %v463_v42  ;;  %v466_v46 = vld [vmem:[%s1399_s10 + $0x58] sm:$0xff]  ;;  %v467_v48 = vld [vmem:[%s1399_s10 + $0x60] sm:$0xff]  ;;  %v468_v49 = vld [vmem:[%s1399_s10 + $0x68] sm:$0xff] }
  0x81   : > { %843 = vmatpush3.bf16.msra.mxu0 %v842_v13  ;;  %v875_v47 = vpack.c.bf16 %v466_v46, %v465_v45  ;;  %v878_v50 = vpack.c.bf16 %v468_v49, %v467_v48  ;;  %v469_v51 = vld [vmem:[%s1399_s10 + $0x70] sm:$0xff]  ;;  %v470_v52 = vld [vmem:[%s1399_s10 + $0x78] sm:$0xff]  ;;  %v454_v24 = vld [vmem:[#allocation2 + $0x10] sm:$0xff] }
  0x82   : > { %844 = vmatprep.subr.bf16.mxu0 %v1157_v4  ;;  %v881_v53 = vpack.c.bf16 %v470_v52, %v469_v51  ;;  %v707_v54 = vld [vmem:[%s321_s12] ss:$0 sm:$0xff]  ;;  %v453_v20 = vld [vmem:[#allocation2 + $0x8] sm:$0xff] }
  0x83   : > { %867 = vmatpush3.bf16.msra.mxu1 %v866_v25  ;;  %v452_v16 = vld [vmem:[#allocation2] sm:$0xff] }
  0x84   : > { %868 = vmatprep.subr.bf16.mxu1 %v1157_v4  ;;  %v709_v28 = vld [vmem:[%s1516_s4] ss:$0 sm:$0xff] (!%p708_p1) }
  0x85   : > { %846 = vmatpush3.bf16.msra.mxu0 %v845_v22 }
  0x86   : > { %847 = vmatprep.subr.bf16.mxu0 %v1157_v4 }
  0x87   : > { %870 = vmatpush3.bf16.msra.mxu1 %v869_v41 }
  0x88   : > { %871 = vmatprep.subr.bf16.mxu1 %v1157_v4 }
  0x89   : > { %849 = vmatpush3.bf16.msra.mxu0 %v848_v26 }
  0x8a   : > { %850 = vmatprep.subr.bf16.mxu0 %v1157_v4 }
  0x8b   : > { %873 = vmatpush3.bf16.msra.mxu1 %v872_v44 }
  0x8c   : > { %874 = vmatprep.subr.bf16.mxu1 %v1157_v4 }
  0x8d   : > { %852 = vmatpush3.bf16.msra.mxu0 %v851_v29 }
  0x8e   : > { %853 = vmatprep.subr.bf16.mxu0 %v1157_v4 }
  0x8f   : > { %876 = vmatpush3.bf16.msra.mxu1 %v875_v47 }
  0x90   : > { %877 = vmatprep.subr.bf16.mxu1 %v1157_v4 }
  0x91   : > { %855 = vmatpush3.bf16.msra.mxu0 %v854_v32 }
  0x92   : > { %856 = vmatprep.subr.bf16.mxu0 %v1157_v4 }
  0x93   : > { %879 = vmatpush3.bf16.msra.mxu1 %v878_v50 }
  0x94   : > { %880 = vmatprep.subr.bf16.mxu1 %v1157_v4 }
  0x95   : > { %858 = vmatpush3.bf16.msra.mxu0 %v857_v35 }
  0x97   : > { %882 = vmatpush3.bf16.msra.mxu1 %v881_v53 }
  0x98   : > { %786 = vmatmul.mubr.f32.vlgmr.msra.gmra.mrb[0].mxu0 %v331_v36 }
  0x99   : > { %788 = vmatprep.mubr.msk.f32.mxu0 %vm1158_vm0, %v1159_v7 }
  0x9c   : > { %789 = vmatmul.mubr.f32.gmra.mrb[2].mxu0 %v332_v37 }
  0x9d   : > { %791 = vmatprep.mubr.msk.f32.mxu0 %vm1158_vm0, %v1159_v7 }
  0xa0   : > { %792 = vmatmul.mubr.f32.gmra.mrb[4].mxu0 %v333_v38 }
 0x16b   : > { %v423_v55 = vpop.f32.mrb[0].mxu0 }
 0x16c   : > { %v424_v56 = vadd.f32 %v707_v54, %v423_v55  ;;  %v787_v57 = vpop.f32.mrb[1].mxu0 }
 0x16e   : > { %v440_v58 = vmul.f32 0.70710677, %v424_v56  ;;  %v437_v4 = vmul.f32 0.5, %v424_v56 }
 0x16f   : > { %v428_v59 = vpop.f32.mrb[2].mxu0 }
 0x170   : > { %970 = verf.f32 %v440_v58  ;;  %v429_v60 = vadd.f32 %v707_v54, %v428_v59  ;;  %v790_v61 = vpop.f32.mrb[3].mxu0 }
 0x172   : > { %v441_v62 = vmul.f32 0.70710677, %v429_v60  ;;  %v438_v9 = vmul.f32 0.5, %v429_v60 }
 0x173   : > { %v433_v63 = vpop.f32.mrb[4].mxu0 }
 0x174   : > { %972 = verf.f32 %v441_v62  ;;  %v434_v0 = vadd.f32 %v707_v54, %v433_v63  ;;  %v793_v1 = vpop.f32.mrb[5].mxu0 }
 0x176   : > { %v442_v2 = vmul.f32 0.70710677, %v434_v0  ;;  %v439_v13 = vmul.f32 0.5, %v434_v0 }
 0x178   : > { %974 = verf.f32 %v442_v2 }
 0x17a   : > { %v971_v3 = vpop.eup %970 }
 0x17b   : > { %v446_v5 = vadd.f32 1.0, %v971_v3 }
 0x17d   : > { %v449_v6 = vmul.f32 %v446_v5, %v437_v4 }
 0x17e   : > { %v973_v8 = vpop.eup %972 }
 0x17f   : > { %v447_v10 = vadd.f32 1.0, %v973_v8  ;;  %827 = vmatmul.mubr.f32.vlgmr.msra.gmra.mrb[0].mxu1 %v449_v6 }
 0x180   : > { %829 = vmatprep.mubr.msk.f32.mxu1 %vm1158_vm0, %v1159_v7 }
 0x181   : > { %v450_v11 = vmul.f32 %v447_v10, %v438_v9 }
 0x182   : > { %v975_v12 = vpop.eup %974 }
 0x183   : > { %v448_v14 = vadd.f32 1.0, %v975_v12  ;;  %830 = vmatmul.mubr.f32.gmra.mrb[2].mxu1 %v450_v11 }
 0x184   : > { %832 = vmatprep.mubr.msk.f32.mxu1 %vm1158_vm0, %v1159_v7 }
 0x185   : > { %v451_v15 = vmul.f32 %v448_v14, %v439_v13 }
 0x187   : > { %833 = vmatmul.mubr.f32.gmra.mrb[4].mxu1 %v451_v15 }
 0x252   : > { %v537_v17 = vpop.f32.mrb[0].mxu1 }
 0x253   : > { %v551_v18 = vadd.f32 %v537_v17, %v452_v16  ;;  %v828_v19 = vpop.f32.mrb[1].mxu1 }
 0x255   : > { %554 = vst [vmem:[#allocation2] sm:$0xff] %v551_v18 }
 0x256   : > { %v542_v21 = vpop.f32.mrb[2].mxu1 }
 0x257   : > { %v552_v22 = vadd.f32 %v542_v21, %v453_v20  ;;  %v831_v23 = vpop.f32.mrb[3].mxu1  ;;  %560 = sbr.rel (%p708_p1) target bundleno = 616 (0x268), region = 60 }
 0x259   : > { %555 = vst [vmem:[#allocation2 + $0x8] sm:$0xff] %v552_v22 }
 0x25a   : > { %v547_v25 = vpop.f32.mrb[4].mxu1 }
 0x25b   : > { %v553_v26 = vadd.f32 %v547_v25, %v454_v24  ;;  %v834_v27 = vpop.f32.mrb[5].mxu1 }
 0x25c   : > { %v561_v7 = vld [vmem:[#allocation2] sm:$0xff] (!%p708_p1) }
 0x25d   : > { %556 = vst [vmem:[#allocation2 + $0x10] sm:$0xff] %v553_v26  ;;  %v571_v30 = vadd.f32 (!%p708_p1), %v709_v28, %v561_v7 }
 0x25f   : > { %574 = vst [vmem:[#allocation9] sm:$0xff] %v571_v30 }
 0x260   : > { %v562_v29 = vld [vmem:[#allocation2 + $0x8] sm:$0xff] }
 0x261   : > { %v572_v31 = vadd.f32 %v709_v28, %v562_v29 }
 0x263   : > { %575 = vst [vmem:[#allocation9 + $0x8] sm:$0xff] %v572_v31 }
 0x264   : > { %v563_v32 = vld [vmem:[#allocation2 + $0x10] sm:$0xff] }
 0x265   : > { %v573_v33 = vadd.f32 %v709_v28, %v563_v32 }
 0x267   : > { %576 = vst [vmem:[#allocation9 + $0x10] sm:$0xff] %v573_v33 }
 0x268 PF: > { %p909_p6 = scmp.eq.s32.totalorder %s1290_s16, 1  ;;  %s1160_s14 = smov [#allocation9]  }
 0x269   : > { %s586_s21 = sshll.u32 %s1160_s14, 4  ;;  %s587_s21 = int_to_ptr.vmem [resolvable:$true] %s586_s21 }
 0x26a   : > { %s1064_s28 = scalar_lea.vmem %s587_s21, 384  ;;  %p1071_p12 = scmp.lt.s32.totalorder %s587_s21, %s587_s21 }
 0x26b   : > { %p1065_p4 = scmp.ne.s32.totalorder %s587_s21, %s1064_s28  ;;  %p1072_p10 = scmp.lt.s32.totalorder %s1064_s28, %s1064_s28 }
 0x26d   : > { %p1066_p7 = pnand %p1065_p4, %p909_p6  ;;  %p1073_p0 = por %p1072_p10, %p1071_p12 }
 0x26f   : > { %p1067_p9 = pneg %p1066_p7 }
 0x271   : > { %p1074_p8 = pnand %p1073_p0, %p1067_p9 }
 0x273   : > { %1077 = shalt.err (!%p1074_p8)
}
 0x274   : > { %s1078_s27 = scalar_lea.hbm %s1517_s5, 384 }
 0x275   : > { %p1079_p13 = scmp.ne.s32.totalorder %s1517_s5, %s1078_s27  ;;  %p1084_p5 = scmp.lt.u32.totalorder %s1078_s27, %s1517_s5 }
 0x277   : > { %p1080_p2 = pnand %p1079_p13, %p909_p6 }
 0x279   : > { %p1081_p3 = pneg %p1080_p2 }
 0x27b   : > { %p1086_p11 = pnand %p1084_p5, %p1081_p3 }
 0x27d   : > { %1089 = shalt.err (!%p1086_p11)
}
 0x27e   : > { %s1161_s15 = smov 128   ;;  %s1162_s25 = smov 8  }
 0x27f   : > { %892 = dma.vmem_to_hbm [thread:$0]  (%p909_p6), %s587_s21, 384, %s1517_s5, [#allocation5], %s1161_s15, %s1161_s15, %s1162_s25  }
 0x280   : > { %1123 = dma.done.wait (%p909_p6), [#allocation5], 384  }
 0x281   : > { %1125 = vsyncadd (%p909_p6), [#allocation5], 4294966912 }
 0x282 PF: > { %s20_s23 = sadd.s32 1, %s1148_s23   ;;  %s1530_s18 = smov %s1132_s19 }
 0x283   : > { %p17_p1 = scmp.ge.s32.totalorder %s20_s23, 4   ;;  %s1531_s19 = smov %s1136_s20 }
 0x284   : > { %s1532_s20 = smov %s1240_s30  ;;  %s1533_s21 = smov %s1144_s22 }
 0x285   : > { %s1534_s22 = smov %s1536_s24  ;;  %19 = sbr.rel (!%p17_p1) target bundleno = 6 (0x6), region = 106 }
 0x28c   :  { %602 = vsyncpa [#allocation4], 1 }
 0x28d   :  { %604 = vsyncpa [#allocation4 + $0x1], 1 }
 0x28e   :  { %605 = vsyncpa [#allocation7], 1 }
 0x28f   :  { %607 = vsyncpa [#allocation7 + $0x1], 1 }
 0x290   :  { %608 = vsyncpa [#allocation5], 1 }
 0x291   :  { %610 = vsyncpa [#allocation5 + $0x1], 1 }

// kernel: tpu_custom_call.1
= control target key start
LH: loop header
LB: loop body
LE: loop exit
PB: predicated region body
PF: predicated region fallthrough
CT: control target
= control target key end

     0   :  { %10 = vsyncpa [#allocation4], 0  ;;  %s1512_s0 = inlined_call_operand.hbm [shape: f32[18,128], index: 0, kind: input, shape index: {}]   ;;  %s1513_s1 = inlined_call_operand.hbm [shape: f32[128,256], index: 1, kind: input, shape index: {}]   ;;  %s1514_s2 = inlined_call_operand.vmem [shape: f32[1,256], index: 2, kind: input, shape index: {}]   ;;  %s1515_s3 = inlined_call_operand.hbm [shape: f32[256,128], index: 3, kind: input, shape index: {}]   ;;  %s1516_s4 = inlined_call_operand.vmem [shape: f32[1,128], index: 4, kind: input, shape index: {}]   ;;  %s1517_s5 = inlined_call_operand.hbm [shape: f32[18,128], index: 5, kind: output, shape index: {}]  }
   0x1   :  { %11 = vsyncpa [#allocation7], 0 }
   0x2   :  { %13 = vsyncpa [#allocation7 + $0x1], 0 }
   0x3   :  { %14 = vsyncpa [#allocation5], 0  ;;  %s1193_s18 = smov 0   ;;  %s1195_s19 = smov 0  }
   0x4   :  { %s1197_s20 = smov 0   ;;  %s1199_s21 = smov 0  }
   0x5   :  { %s1201_s22 = smov 0   ;;  %s1203_s23 = smov 0  }
   0x6 LB: > { %s29_s24 = sadd.s32 1, %s1144_s22  ;;  %s65_s25 = sadd.s32 1, %s1136_s20  ;;  %s1148_s23 = sphi %s1203_s23, %s20_s23   ;;  %s1144_s22 = sphi %s1201_s22, %s1534_s22   ;;  %s1140_s21 = sphi %s1199_s21, %s1533_s21   ;;  %s1136_s20 = sphi %s1197_s20, %s1532_s20   ;;  %s1132_s19 = sphi %s1195_s19, %s1531_s19   ;;  %s1128_s18 = sphi %s1193_s18, %s1530_s18  }
   0x7   : > { %p30_p0 = scmp.ge.s32.totalorder %s29_s24, 2  ;;  %p72_p1 = scmp.ne.s32.totalorder %s1136_s20, %s1132_s19 }
   0x8   : > { %p73_p2 = scmp.eq.s32.totalorder %s1148_s23, 0  ;;  %p907_p5 = scmp.lt.s32.totalorder %s1148_s23, 2 }
   0x9   : > { %s1536_s24 = smov (%p30_p0, %s29_s24), 0  ;;  %s220_s28 = sand.u32 1, %s1148_s23  }
   0xa   : > { %p1230_p3 = por %p73_p2, %p72_p1  ;;  %s62_s27 = ssub.s32 %s1144_s22, %s1536_s24 }
   0xb   : > { %p63_p4 = scmp.eq.s32.totalorder %s62_s27, 0  ;;  %s222_s29 = sand.u32 1, %s1136_s20  }
   0xc   : > { %s1242_s6 = sshll.u32 %s222_s29, 7  ;;  %s698_s7 = sshll.u32 %s1144_s22, 7 }
   0xd   : > { %s1240_s30 = scalar_select %p63_p4, %s1136_s20, %s65_s25  }
   0xe   : > { %s1248_s10 = scalar_lea.hbm %s1513_s1, %s698_s7  ;;  %s224_s11 = scalar_lea.vmem [#allocation6], %s1242_s6 }
   0xf   : > { %s230_s12 = sshll.u32 %s224_s11, 4  ;;  %p1255_p6 = pnand %p907_p5, %p1230_p3  ;;  %s1251_s12 = int_to_ptr.vmem [resolvable:$true] %s230_s12 }
  0x10   : > { %s1259_s14 = scalar_lea.sflag [#allocation7], %s220_s28  ;;  %s976_s15 = scalar_lea.hbm %s1248_s10, 2048 }
  0x11   : > { %p977_p7 = scmp.ne.s32.totalorder %s1248_s10, %s976_s15  ;;  %p978_p8 = pneg %p1255_p6 }
  0x12   : > { %s981_s25 = scalar_lea.hbm %s1513_s1, 4096  ;;  %p982_p11 = scmp.lt.u32.totalorder %s1248_s10, %s1513_s1 }
  0x13   : > { %p979_p9 = pnand %p978_p8, %p977_p7  ;;  %p983_p12 = scmp.lt.u32.totalorder %s981_s25, %s976_s15 }
  0x14   : > { %p985_p0 = scmp.lt.u32.totalorder %s976_s15, %s1248_s10 }
  0x15   : > { %p980_p10 = pneg %p979_p9  ;;  %p984_p13 = por %p983_p12, %p982_p11 }
  0x17   : > { %p986_p1 = por %p985_p0, %p984_p13 }
  0x19   : > { %p987_p2 = pnand %p986_p1, %p980_p10 }
  0x1b   : > { %990 = shalt.err (!%p987_p2)
}
  0x1c   : > { %s991_s28 = scalar_lea.vmem %s1251_s12, 2048  ;;  %s1150_s29 = smov [#allocation6]  }
  0x1d   : > { %p992_p3 = scmp.ne.s32.totalorder %s1251_s12, %s991_s28  ;;  %s996_s7 = sshll.u32 %s1150_s29, 4  ;;  %s997_s7 = int_to_ptr.vmem [resolvable:$false] %s996_s7 }
  0x1e   : > { %s998_s8 = scalar_lea.vmem %s997_s7, 4096  ;;  %p999_p7 = scmp.lt.s32.totalorder %s1251_s12, %s997_s7 }
  0x1f   : > { %p994_p4 = pnand %p992_p3, %p978_p8  ;;  %p1000_p9 = scmp.lt.s32.totalorder %s998_s8, %s991_s28 }
  0x21   : > { %p995_p5 = pneg %p994_p4  ;;  %p1001_p11 = por %p1000_p9, %p999_p7 }
  0x23   : > { %p1002_p12 = pnand %p1001_p11, %p995_p5 }
  0x25   : > { %1005 = shalt.err (!%p1002_p12)
}
  0x26   : > { %s1151_s9 = smov 256   ;;  %s1152_s11 = smov 128  }
  0x27   : > { %s1153_s15 = smov 8   ;;  %s1290_s16 = sadd.s32 4294967295, %s1148_s23  }
  0x28   : > { %902 = dma.hbm_to_vmem [thread:$0]  (!%p1255_p6), %s1248_s10, 2048, %s1251_s12, %s1259_s14, %s1151_s9, %s1152_s11, %s1153_s15  }
  0x29   : > { %p78_p10 = scmp.ne.s32.totalorder %s1132_s19, %s1128_s18  ;;  %p1518_p13 = scmp.eq.s32.totalorder %s1290_s16, 0 }
  0x2a   : > { %p694_p0 = scmp.ge.s32.totalorder %s1148_s23, 1  ;;  %p188_p1 = scmp.lt.s32.totalorder %s1148_s23, 3 }
  0x2b   : > { %p1299_p2 = por %p1518_p13, %p78_p10  ;;  %s1154_s10 = smov [#allocation3]  }
  0x2c   : > { %p1303_p3 = pnand %p694_p0, %p188_p1  ;;  %s203_s12 = sshll.u32 %s1154_s10, 4  ;;  %s1307_s12 = int_to_ptr.vmem [resolvable:$true] %s203_s12 }
  0x2d   : > { %s1523_s17 = scalar_select %p1299_p2, 1, 0 }
  0x2e   : > { %s1524_s25 = scalar_select %p1303_p3, 1, 0 }
  0x2f   : > { %p895_p4 = pneg %p1303_p3  ;;  %s714_s18 = sshll.u32 %s1144_s22, 11 }
  0x30   : > { %s1315_s28 = scalar_lea.hbm %s1515_s3, %s714_s18  ;;  %s250_s29 = scalar_lea.vmem [#allocation8], %s1242_s6 }
  0x31   : > { %s257_s7 = sshll.u32 %s250_s29, 4  ;;  %p1320_p5 = pnand %p895_p4, %p1518_p13  ;;  %s1324_s7 = int_to_ptr.vmem [resolvable:$true] %s257_s7 }
  0x32   : > { %s1006_s9 = scalar_lea.hbm %s1315_s28, 2048  ;;  %s1011_s26 = scalar_lea.hbm %s1515_s3, 4096 }
  0x33   : > { %p1007_p7 = scmp.ne.s32.totalorder %s1315_s28, %s1006_s9  ;;  %p1012_p12 = scmp.lt.u32.totalorder %s1315_s28, %s1515_s3 }
  0x34   : > { %p1013_p10 = scmp.lt.u32.totalorder %s1011_s26, %s1006_s9  ;;  %p1015_p1 = scmp.lt.u32.totalorder %s1006_s9, %s1315_s28 }
  0x35   : > { %p1009_p9 = pnand %p1007_p7, %p978_p8 }
  0x36   : > { %p1014_p0 = por %p1013_p10, %p1012_p12 }
  0x37   : > { %p1010_p11 = pneg %p1009_p9 }
  0x38   : > { %p1016_p4 = por %p1015_p1, %p1014_p0 }
  0x3a   : > { %p1017_p13 = pnand %p1016_p4, %p1010_p11 }
  0x3c   : > { %1020 = shalt.err (!%p1017_p13)
}
  0x3d   : > { %s1021_s29 = scalar_lea.vmem %s1324_s7, 2048  ;;  %s1155_s10 = smov [#allocation8]  }
  0x3e   : > { %p1022_p7 = scmp.ne.s32.totalorder %s1324_s7, %s1021_s29  ;;  %s1026_s18 = sshll.u32 %s1155_s10, 4  ;;  %s1027_s18 = int_to_ptr.vmem [resolvable:$false] %s1026_s18 }
  0x3f   : > { %s1028_s27 = scalar_lea.vmem %s1027_s18, 4096  ;;  %p1029_p3 = scmp.lt.s32.totalorder %s1324_s7, %s1027_s18 }
  0x40   : > { %p1024_p9 = pnand %p1022_p7, %p978_p8  ;;  %p1030_p12 = scmp.lt.s32.totalorder %s1028_s27, %s1021_s29 }
  0x42   : > { %p1025_p2 = pneg %p1024_p9  ;;  %p1031_p10 = por %p1030_p12, %p1029_p3 }
  0x44   : > { %p1032_p0 = pnand %p1031_p10, %p1025_p2 }
  0x46   : > { %1035 = shalt.err (!%p1032_p0)
}
  0x47   : > { %905 = dma.hbm_to_vmem [thread:$0]  (!%p1255_p6), %s1315_s28, 2048, %s1324_s7, %s1259_s14, %s1152_s11, %s1152_s11, %s1153_s15  }
  0x48   : > { %s1036_s6 = scalar_lea.hbm %s1512_s0, 384  ;;  %p1038_p13 = pneg %p1320_p5 }
  0x49   : > { %p1037_p8 = scmp.ne.s32.totalorder %s1512_s0, %s1036_s6  ;;  %p1043_p11 = scmp.lt.u32.totalorder %s1036_s6, %s1512_s0 }
  0x4b   : > { %p1039_p2 = pnand %p1038_p13, %p1037_p8 }
  0x4d   : > { %p1040_p3 = pneg %p1039_p2 }
  0x4f   : > { %p1045_p1 = pnand %p1043_p11, %p1040_p3 }
  0x51   : > { %1048 = shalt.err (!%p1045_p1)
}
  0x52   : > { %s1049_s14 = scalar_lea.vmem %s1307_s12, 384  ;;  %p1057_p9 = scmp.lt.s32.totalorder %s1307_s12, %s1307_s12 }
  0x53   : > { %p1050_p6 = scmp.ne.s32.totalorder %s1307_s12, %s1049_s14  ;;  %p1058_p12 = scmp.lt.s32.totalorder %s1049_s14, %s1049_s14 }
  0x55   : > { %p1052_p4 = pnand %p1050_p6, %p1038_p13  ;;  %p1059_p10 = por %p1058_p12, %p1057_p9 }
  0x57   : > { %p1053_p7 = pneg %p1052_p4 }
  0x59   : > { %p1060_p0 = pnand %p1059_p10, %p1053_p7 }
  0x5b   : > { %1063 = shalt.err (!%p1060_p0)
}
  0x5c   : > { %898 = dma.hbm_to_vmem [thread:$0]  (!%p1320_p5), %s1512_s0, 384, %s1307_s12, [#allocation4], %s1152_s11, %s1152_s11, %s1153_s15  }
  0x5d   : > { %p1526_p8 = scmp.ne.s32.totalorder %s1524_s25, 0 }
  0x5e   : > { %p1527_p13 = scmp.eq.s32.totalorder (!%p1526_p8), %s1290_s16, 0 }
  0x5f   : > { %269 = sbr.rel (%p1526_p8) target bundleno = 642 (0x282), region = 40 }
  0x66   : > { %1115 = dma.done.wait (%p1527_p13), [#allocation4], 384   ;;  %p1528_p2 = pmov %p1527_p13 }
  0x67   : > { %s275_s8 = sand.u32 1, %s1290_s16   ;;  %s277_s27 = sand.u32 1, %s1132_s19  }
  0x68   : > { %1117 = vsyncadd (%p1528_p2), [#allocation4], 4294966912  ;;  %s704_s9 = sshll.u32 %s277_s27, 7  ;;  %s276_s26 = scalar_lea.sflag [#allocation7], %s275_s8 }
  0x69   : > { %s1385_s6 = scalar_lea.vmem [#allocation6], %s704_s9  ;;  %p1529_p3 = scmp.ne.s32.totalorder %s1523_s17, 0 }
  0x6b   : > { %1119 = dma.done.wait (%p1529_p3), %s276_s26, 4096  }
  0x6c   : > { %1121 = vsyncadd (%p1529_p3), %s276_s26, 4294963200  ;;  %p319_p5 = scmp.lt.s32.totalorder %s1140_s21, 1  ;;  %s1399_s10 = scalar_lea.vmem [#allocation8], %s704_s9 }
  0x6d   : > { %p706_p11 = scmp.ne.s32.totalorder %s1140_s21, 0 }
  0x6e   : > { %s1393_s11 = scalar_select %p319_p5, %s1140_s21, 1 }
  0x6f   : > { %327 = sbr.rel (%p706_p11) target bundleno = 118 (0x76), region = 56  ;;  %v1156_v0 = vmov (!%p706_p11), 0.0  }
  0x70   : > { %s321_s12 = scalar_lea.vmem %s1514_s2, %s1393_s11  ;;  %328 = vst [vmem:[#allocation2] sm:$0xff] (!%p706_p11), %v1156_v0  ;;  %329 = vst [vmem:[#allocation2 + $0x8] sm:$0xff] (!%p706_p11), %v1156_v0 }
  0x71   : > { %330 = vst [vmem:[#allocation2 + $0x10] sm:$0xff] (!%p706_p11), %v1156_v0 }
  0x76 PF: > { %v334_v1 = vld [vmem:[%s1385_s6] sm:$0xff]  ;;  %v335_v2 = vld [vmem:[%s1385_s6 + $0x8] sm:$0xff]  ;;  %v336_v3 = vld [vmem:[%s1385_s6 + $0x10] sm:$0xff]  ;;  %v1157_v4 = vmov 0.0|0.0   ;;  %vm1158_vm0 = vmmov 0   ;;  %v1159_v7 = vmov 0.0  }
  0x77   : > { %835 = vmatprep.subr.bf16.mxu0 %v1157_v4  ;;  %v836_v5 = vpack.c.bf16 %v335_v2, %v334_v1  ;;  %v337_v6 = vld [vmem:[%s1385_s6 + $0x18] sm:$0xff]  ;;  %785 = vmatprep.mubr.msk.f32.mxu0 %vm1158_vm0, %v1159_v7  ;;  %v338_v9 = vld [vmem:[%s1385_s6 + $0x20] sm:$0xff]  ;;  %v339_v10 = vld [vmem:[%s1385_s6 + $0x28] sm:$0xff]  ;;  %p708_p1 = scmp.ne.s32.totalorder %s1140_s21, 1 }
  0x78   : > { %859 = vmatprep.subr.bf16.mxu1 %v1157_v4  ;;  %826 = vmatprep.mubr.msk.f32.mxu1 %vm1158_vm0, %v1159_v7  ;;  %v839_v8 = vpack.c.bf16 %v337_v6, %v336_v3  ;;  %v455_v11 = vld [vmem:[%s1399_s10] sm:$0xff]  ;;  %v456_v12 = vld [vmem:[%s1399_s10 + $0x8] sm:$0xff]  ;;  %v842_v13 = vpack.c.bf16 %v339_v10, %v338_v9  ;;  %v457_v15 = vld [vmem:[%s1399_s10 + $0x10] sm:$0xff] }
  0x79   : > { %837 = vmatpush3.bf16.msra.mxu0 %v836_v5  ;;  %v860_v14 = vpack.c.bf16 %v456_v12, %v455_v11  ;;  %v458_v16 = vld [vmem:[%s1399_s10 + $0x18] sm:$0xff]  ;;  %v340_v17 = vld [vmem:[%s1385_s6 + $0x30] sm:$0xff]  ;;  %v459_v20 = vld [vmem:[%s1399_s10 + $0x20] sm:$0xff] }
  0x7a   : > { %838 = vmatprep.subr.bf16.mxu0 %v1157_v4  ;;  %v341_v18 = vld [vmem:[%s1385_s6 + $0x38] sm:$0xff]  ;;  %v863_v19 = vpack.c.bf16 %v458_v16, %v457_v15  ;;  %v460_v21 = vld [vmem:[%s1399_s10 + $0x28] sm:$0xff]  ;;  %v342_v23 = vld [vmem:[%s1385_s6 + $0x40] sm:$0xff] }
  0x7b   : > { %861 = vmatpush3.bf16.msra.mxu1 %v860_v14  ;;  %v845_v22 = vpack.c.bf16 %v341_v18, %v340_v17  ;;  %v343_v24 = vld [vmem:[%s1385_s6 + $0x48] sm:$0xff]  ;;  %v866_v25 = vpack.c.bf16 %v460_v21, %v459_v20  ;;  %v344_v27 = vld [vmem:[%s1385_s6 + $0x50] sm:$0xff]  ;;  %v345_v28 = vld [vmem:[%s1385_s6 + $0x58] sm:$0xff] }
  0x7c   : > { %862 = vmatprep.subr.bf16.mxu1 %v1157_v4  ;;  %v848_v26 = vpack.c.bf16 %v343_v24, %v342_v23  ;;  %v851_v29 = vpack.c.bf16 %v345_v28, %v344_v27  ;;  %v346_v30 = vld [vmem:[%s1385_s6 + $0x60] sm:$0xff]  ;;  %v347_v31 = vld [vmem:[%s1385_s6 + $0x68] sm:$0xff]  ;;  %v348_v33 = vld [vmem:[%s1385_s6 + $0x70] sm:$0xff] }
  0x7d   : > { %840 = vmatpush3.bf16.msra.mxu0 %v839_v8  ;;  %v854_v32 = vpack.c.bf16 %v347_v31, %v346_v30  ;;  %v349_v34 = vld [vmem:[%s1385_s6 + $0x78] sm:$0xff]  ;;  %v331_v36 = vld [vmem:[#allocation3] sm:$0xff]  ;;  %v332_v37 = vld [vmem:[#allocation3 + $0x8] sm:$0xff] }
  0x7e   : > { %841 = vmatprep.subr.bf16.mxu0 %v1157_v4  ;;  %v857_v35 = vpack.c.bf16 %v349_v34, %v348_v33  ;;  %v333_v38 = vld [vmem:[#allocation3 + $0x10] sm:$0xff]  ;;  %v461_v39 = vld [vmem:[%s1399_s10 + $0x30] sm:$0xff]  ;;  %v463_v42 = vld [vmem:[%s1399_s10 + $0x40] sm:$0xff] }
  0x7f   : > { %864 = vmatpush3.bf16.msra.mxu1 %v863_v19  ;;  %v462_v40 = vld [vmem:[%s1399_s10 + $0x38] sm:$0xff]  ;;  %v464_v43 = vld [vmem:[%s1399_s10 + $0x48] sm:$0xff]  ;;  %v465_v45 = vld [vmem:[%s1399_s10 + $0x50] sm:$0xff] }
  0x80   : > { %865 = vmatprep.subr.bf16.mxu1 %v1157_v4  ;;  %v869_v41 = vpack.c.bf16 %v462_v40, %v461_v39  ;;  %v872_v44 = vpack.c.bf16 %v464_v43, %v463_v42  ;;  %v466_v46 = vld [vmem:[%s1399_s10 + $0x58] sm:$0xff]  ;;  %v467_v48 = vld [vmem:[%s1399_s10 + $0x60] sm:$0xff]  ;;  %v468_v49 = vld [vmem:[%s1399_s10 + $0x68] sm:$0xff] }
  0x81   : > { %843 = vmatpush3.bf16.msra.mxu0 %v842_v13  ;;  %v875_v47 = vpack.c.bf16 %v466_v46, %v465_v45  ;;  %v878_v50 = vpack.c.bf16 %v468_v49, %v467_v48  ;;  %v469_v51 = vld [vmem:[%s1399_s10 + $0x70] sm:$0xff]  ;;  %v470_v52 = vld [vmem:[%s1399_s10 + $0x78] sm:$0xff]  ;;  %v454_v24 = vld [vmem:[#allocation2 + $0x10] sm:$0xff] }
  0x82   : > { %844 = vmatprep.subr.bf16.mxu0 %v1157_v4  ;;  %v881_v53 = vpack.c.bf16 %v470_v52, %v469_v51  ;;  %v707_v54 = vld [vmem:[%s321_s12] ss:$0 sm:$0xff]  ;;  %v453_v20 = vld [vmem:[#allocation2 + $0x8] sm:$0xff] }
  0x83   : > { %867 = vmatpush3.bf16.msra.mxu1 %v866_v25  ;;  %v452_v16 = vld [vmem:[#allocation2] sm:$0xff] }
  0x84   : > { %868 = vmatprep.subr.bf16.mxu1 %v1157_v4  ;;  %v709_v28 = vld [vmem:[%s1516_s4] ss:$0 sm:$0xff] (!%p708_p1) }
  0x85   : > { %846 = vmatpush3.bf16.msra.mxu0 %v845_v22 }
  0x86   : > { %847 = vmatprep.subr.bf16.mxu0 %v1157_v4 }
  0x87   : > { %870 = vmatpush3.bf16.msra.mxu1 %v869_v41 }
  0x88   : > { %871 = vmatprep.subr.bf16.mxu1 %v1157_v4 }
  0x89   : > { %849 = vmatpush3.bf16.msra.mxu0 %v848_v26 }
  0x8a   : > { %850 = vmatprep.subr.bf16.mxu0 %v1157_v4 }
  0x8b   : > { %873 = vmatpush3.bf16.msra.mxu1 %v872_v44 }
  0x8c   : > { %874 = vmatprep.subr.bf16.mxu1 %v1157_v4 }
  0x8d   : > { %852 = vmatpush3.bf16.msra.mxu0 %v851_v29 }
  0x8e   : > { %853 = vmatprep.subr.bf16.mxu0 %v1157_v4 }
  0x8f   : > { %876 = vmatpush3.bf16.msra.mxu1 %v875_v47 }
  0x90   : > { %877 = vmatprep.subr.bf16.mxu1 %v1157_v4 }
  0x91   : > { %855 = vmatpush3.bf16.msra.mxu0 %v854_v32 }
  0x92   : > { %856 = vmatprep.subr.bf16.mxu0 %v1157_v4 }
  0x93   : > { %879 = vmatpush3.bf16.msra.mxu1 %v878_v50 }
  0x94   : > { %880 = vmatprep.subr.bf16.mxu1 %v1157_v4 }
  0x95   : > { %858 = vmatpush3.bf16.msra.mxu0 %v857_v35 }
  0x97   : > { %882 = vmatpush3.bf16.msra.mxu1 %v881_v53 }
  0x98   : > { %786 = vmatmul.mubr.f32.vlgmr.msra.gmra.mrb[0].mxu0 %v331_v36 }
  0x99   : > { %788 = vmatprep.mubr.msk.f32.mxu0 %vm1158_vm0, %v1159_v7 }
  0x9c   : > { %789 = vmatmul.mubr.f32.gmra.mrb[2].mxu0 %v332_v37 }
  0x9d   : > { %791 = vmatprep.mubr.msk.f32.mxu0 %vm1158_vm0, %v1159_v7 }
  0xa0   : > { %792 = vmatmul.mubr.f32.gmra.mrb[4].mxu0 %v333_v38 }
 0x16b   : > { %v423_v55 = vpop.f32.mrb[0].mxu0 }
 0x16c   : > { %v424_v56 = vadd.f32 %v707_v54, %v423_v55  ;;  %v787_v57 = vpop.f32.mrb[1].mxu0 }
 0x16e   : > { %v440_v58 = vmul.f32 0.70710677, %v424_v56  ;;  %v437_v4 = vmul.f32 0.5, %v424_v56 }
 0x16f   : > { %v428_v59 = vpop.f32.mrb[2].mxu0 }
 0x170   : > { %970 = verf.f32 %v440_v58  ;;  %v429_v60 = vadd.f32 %v707_v54, %v428_v59  ;;  %v790_v61 = vpop.f32.mrb[3].mxu0 }
 0x172   : > { %v441_v62 = vmul.f32 0.70710677, %v429_v60  ;;  %v438_v9 = vmul.f32 0.5, %v429_v60 }
 0x173   : > { %v433_v63 = vpop.f32.mrb[4].mxu0 }
 0x174   : > { %972 = verf.f32 %v441_v62  ;;  %v434_v0 = vadd.f32 %v707_v54, %v433_v63  ;;  %v793_v1 = vpop.f32.mrb[5].mxu0 }
 0x176   : > { %v442_v2 = vmul.f32 0.70710677, %v434_v0  ;;  %v439_v13 = vmul.f32 0.5, %v434_v0 }
 0x178   : > { %974 = verf.f32 %v442_v2 }
 0x17a   : > { %v971_v3 = vpop.eup %970 }
 0x17b   : > { %v446_v5 = vadd.f32 1.0, %v971_v3 }
 0x17d   : > { %v449_v6 = vmul.f32 %v446_v5, %v437_v4 }
 0x17e   : > { %v973_v8 = vpop.eup %972 }
 0x17f   : > { %v447_v10 = vadd.f32 1.0, %v973_v8  ;;  %827 = vmatmul.mubr.f32.vlgmr.msra.gmra.mrb[0].mxu1 %v449_v6 }
 0x180   : > { %829 = vmatprep.mubr.msk.f32.mxu1 %vm1158_vm0, %v1159_v7 }
 0x181   : > { %v450_v11 = vmul.f32 %v447_v10, %v438_v9 }
 0x182   : > { %v975_v12 = vpop.eup %974 }
 0x183   : > { %v448_v14 = vadd.f32 1.0, %v975_v12  ;;  %830 = vmatmul.mubr.f32.gmra.mrb[2].mxu1 %v450_v11 }
 0x184   : > { %832 = vmatprep.mubr.msk.f32.mxu1 %vm1158_vm0, %v1159_v7 }
 0x185   : > { %v451_v15 = vmul.f32 %v448_v14, %v439_v13 }
 0x187   : > { %833 = vmatmul.mubr.f32.gmra.mrb[4].mxu1 %v451_v15 }
 0x252   : > { %v537_v17 = vpop.f32.mrb[0].mxu1 }
 0x253   : > { %v551_v18 = vadd.f32 %v537_v17, %v452_v16  ;;  %v828_v19 = vpop.f32.mrb[1].mxu1 }
 0x255   : > { %554 = vst [vmem:[#allocation2] sm:$0xff] %v551_v18 }
 0x256   : > { %v542_v21 = vpop.f32.mrb[2].mxu1 }
 0x257   : > { %v552_v22 = vadd.f32 %v542_v21, %v453_v20  ;;  %v831_v23 = vpop.f32.mrb[3].mxu1  ;;  %560 = sbr.rel (%p708_p1) target bundleno = 616 (0x268), region = 60 }
 0x259   : > { %555 = vst [vmem:[#allocation2 + $0x8] sm:$0xff] %v552_v22 }
 0x25a   : > { %v547_v25 = vpop.f32.mrb[4].mxu1 }
 0x25b   : > { %v553_v26 = vadd.f32 %v547_v25, %v454_v24  ;;  %v834_v27 = vpop.f32.mrb[5].mxu1 }
 0x25c   : > { %v561_v7 = vld [vmem:[#allocation2] sm:$0xff] (!%p708_p1) }
 0x25d   : > { %556 = vst [vmem:[#allocation2 + $0x10] sm:$0xff] %v553_v26  ;;  %v571_v30 = vadd.f32 (!%p708_p1), %v709_v28, %v561_v7 }
 0x25f   : > { %574 = vst [vmem:[#allocation9] sm:$0xff] %v571_v30 }
 0x260   : > { %v562_v29 = vld [vmem:[#allocation2 + $0x8] sm:$0xff] }
 0x261   : > { %v572_v31 = vadd.f32 %v709_v28, %v562_v29 }
 0x263   : > { %575 = vst [vmem:[#allocation9 + $0x8] sm:$0xff] %v572_v31 }
 0x264   : > { %v563_v32 = vld [vmem:[#allocation2 + $0x10] sm:$0xff] }
 0x265   : > { %v573_v33 = vadd.f32 %v709_v28, %v563_v32 }
 0x267   : > { %576 = vst [vmem:[#allocation9 + $0x10] sm:$0xff] %v573_v33 }
 0x268 PF: > { %p909_p6 = scmp.eq.s32.totalorder %s1290_s16, 1  ;;  %s1160_s14 = smov [#allocation9]  }
 0x269   : > { %s586_s21 = sshll.u32 %s1160_s14, 4  ;;  %s587_s21 = int_to_ptr.vmem [resolvable:$true] %s586_s21 }
 0x26a   : > { %s1064_s28 = scalar_lea.vmem %s587_s21, 384  ;;  %p1071_p12 = scmp.lt.s32.totalorder %s587_s21, %s587_s21 }
 0x26b   : > { %p1065_p4 = scmp.ne.s32.totalorder %s587_s21, %s1064_s28  ;;  %p1072_p10 = scmp.lt.s32.totalorder %s1064_s28, %s1064_s28 }
 0x26d   : > { %p1066_p7 = pnand %p1065_p4, %p909_p6  ;;  %p1073_p0 = por %p1072_p10, %p1071_p12 }
 0x26f   : > { %p1067_p9 = pneg %p1066_p7 }
 0x271   : > { %p1074_p8 = pnand %p1073_p0, %p1067_p9 }
 0x273   : > { %1077 = shalt.err (!%p1074_p8)
}
 0x274   : > { %s1078_s27 = scalar_lea.hbm %s1517_s5, 384 }
 0x275   : > { %p1079_p13 = scmp.ne.s32.totalorder %s1517_s5, %s1078_s27  ;;  %p1084_p5 = scmp.lt.u32.totalorder %s1078_s27, %s1517_s5 }
 0x277   : > { %p1080_p2 = pnand %p1079_p13, %p909_p6 }
 0x279   : > { %p1081_p3 = pneg %p1080_p2 }
 0x27b   : > { %p1086_p11 = pnand %p1084_p5, %p1081_p3 }
 0x27d   : > { %1089 = shalt.err (!%p1086_p11)
}
 0x27e   : > { %s1161_s15 = smov 128   ;;  %s1162_s25 = smov 8  }
 0x27f   : > { %892 = dma.vmem_to_hbm [thread:$0]  (%p909_p6), %s587_s21, 384, %s1517_s5, [#allocation5], %s1161_s15, %s1161_s15, %s1162_s25  }
 0x280   : > { %1123 = dma.done.wait (%p909_p6), [#allocation5], 384  }
 0x281   : > { %1125 = vsyncadd (%p909_p6), [#allocation5], 4294966912 }
 0x282 PF: > { %s20_s23 = sadd.s32 1, %s1148_s23   ;;  %s1530_s18 = smov %s1132_s19 }
 0x283   : > { %p17_p1 = scmp.ge.s32.totalorder %s20_s23, 4   ;;  %s1531_s19 = smov %s1136_s20 }
 0x284   : > { %s1532_s20 = smov %s1240_s30  ;;  %s1533_s21 = smov %s1144_s22 }
 0x285   : > { %s1534_s22 = smov %s1536_s24  ;;  %19 = sbr.rel (!%p17_p1) target bundleno = 6 (0x6), region = 106 }
 0x28c   :  { %602 = vsyncpa [#allocation4], 1 }
 0x28d   :  { %604 = vsyncpa [#allocation4 + $0x1], 1 }
 0x28e   :  { %605 = vsyncpa [#allocation7], 1 }
 0x28f   :  { %607 = vsyncpa [#allocation7 + $0x1], 1 }
 0x290   :  { %608 = vsyncpa [#allocation5], 1 }
 0x291   :  { %610 = vsyncpa [#allocation5 + $0x1], 1 }

</bundles_post_ra>
